<compile_context>
chip_gen: v7x
topology: tpu7x:2x2x1
jax: 0.10.0
libtpu: 0.0.40
codegen_flags: <defaults>
</compile_context>

<pallas_src>
import math
import functools

import jax
import jax.numpy as jnp
from jax import lax
from jax.experimental import pallas as pl
from jax.experimental.pallas import tpu as pltpu

EPS = 1e-6  # LayerNormalization eps (10 ** -6)


def _custom_layernorm(x, alpha, bias, n):
    # torch module: alpha * (x - mean) / (std + eps) + bias
    # torch.std is *unbiased* (divides by N-1); eps is added to std (not var).
    mean = jnp.mean(x, axis=-1, keepdims=True)
    diff = x - mean
    var = jnp.sum(diff * diff, axis=-1, keepdims=True) / (n - 1.0)
    # (S,1) reciprocal lowers to the EUP slot; the remaining op is a broadcast
    # multiply instead of a full (S,D) f32 divide on the VPU.
    inv = pl.reciprocal(jnp.sqrt(var) + EPS, approx=True)
    return alpha * diff * inv + bias


def encoder_block_kernel(x_ref, mask_ref,
                         wqkv_ref, bqkv_ref,
                         wo_ref, bo_ref,
                         ln1_a_ref, ln1_b_ref,
                         w1_ref, b1_ref, w2_ref, b2_ref,
                         ln2_a_ref, ln2_b_ref,
                         out_ref, *, nhead):
    S, D = x_ref.shape[1], x_ref.shape[2]
    hd = D // nhead
    bf16 = jnp.bfloat16

    x = x_ref[0]        # (S, D) f32 — one batch row per grid step
    neg = mask_ref[0]   # (1, S) f32 additive key-padding mask row

    # ---- residual connection 0: x + MHA(LN(x), LN(x), LN(x), mask) ----
    xn = _custom_layernorm(x, ln1_a_ref[...], ln1_b_ref[...], D)
    # fused QKV projection; 1/sqrt(hd) already folded into the Q columns.
    # Cast to bf16 ONCE (all downstream consumers are bf16 matmul operands).
    qkv = (jnp.dot(xn.astype(bf16), wqkv_ref[...],
                   preferred_element_type=jnp.float32)
           + bqkv_ref[...]).astype(bf16)                       # (S, 3D) bf16

    head_outs = []
    for h in range(nhead):   # nhead is small (4-8); static unroll is cheap here
        qh = qkv[:, h * hd:(h + 1) * hd]
        kh = qkv[:, D + h * hd:D + (h + 1) * hd]
        vh = qkv[:, 2 * D + h * hd:2 * D + (h + 1) * hd]
        # scores = q_scaled @ k^T + mask (contraction avoids explicit transpose)
        scores = lax.dot_general(
            qh, kh, (((1,), (1,)), ((), ())),
            preferred_element_type=jnp.float32) + neg          # (S, S) f32
        m = jnp.max(scores, axis=-1, keepdims=True)
        e = jnp.exp(scores - m)
        p = e * pl.reciprocal(jnp.sum(e, axis=-1, keepdims=True), approx=True)
        # TODO(synk): attention dropout & residual dropout are identity (eval mode).
        head_outs.append(jnp.dot(p.astype(bf16), vh,
                                 preferred_element_type=jnp.float32).astype(bf16))

    # Concat heads along the lane axis, then ONE (S,D)@(D,D) output projection
    # (contraction K = D -> full MXU depth) instead of nhead K=hd matmuls.
    attn_cat = jnp.concatenate(head_outs, axis=-1)             # (S, D) bf16
    attn = jnp.dot(attn_cat, wo_ref[...],
                   preferred_element_type=jnp.float32) + bo_ref[...]
    x1 = x + attn

    # ---- residual connection 1: x1 + FFN(LN(x1)) ----
    xn2 = _custom_layernorm(x1, ln2_a_ref[...], ln2_b_ref[...], D)
    hidden = jnp.maximum(
        jnp.dot(xn2.astype(bf16), w1_ref[...],
                preferred_element_type=jnp.float32) + b1_ref[...], 0.0)
    ff = jnp.dot(hidden.astype(bf16), w2_ref[...],
                 preferred_element_type=jnp.float32) + b2_ref[...]
    out_ref[0] = x1 + ff


def pack_params(params, nhead):
    """One-time weight packing (hoisted out of the per-call path).

    Fuses Q/K/V into a single (D, 3D) matmul, folds the 1/sqrt(hd) softmax
    scale into the Q weights/bias, and casts matmul weights to bf16 (MXU is
    bf16-native; halves weight DMA + VMEM).  Biases / LN params stay f32.
    """
    D = params["wq_t"].shape[0]
    hd = D // nhead
    scale = 1.0 / math.sqrt(hd)
    bf16 = jnp.bfloat16
    w_qkv = jnp.concatenate(
        [params["wq_t"] * scale, params["wk_t"], params["wv_t"]], axis=1)
    b_qkv = jnp.concatenate(
        [params["bq"] * scale, params["bk"], params["bv"]], axis=1)
    return {
        "w_qkv": w_qkv.astype(bf16),
        "b_qkv": b_qkv.astype(jnp.float32),
        "wo_t": params["wo_t"].astype(bf16),
        "bo": params["bo"].astype(jnp.float32),
        "ln1_a": params["ln1_a"], "ln1_b": params["ln1_b"],
        "w1_t": params["w1_t"].astype(bf16), "b1": params["b1"],
        "w2_t": params["w2_t"].astype(bf16), "b2": params["b2"],
        "ln2_a": params["ln2_a"], "ln2_b": params["ln2_b"],
    }


def encoder_block(x, key_padding_mask, packed, nhead):
    """x: (B, S, D) f32; key_padding_mask: (B, S) bool (True = ignore key).

    `packed` comes from pack_params() (computed once, reused across calls).
    """
    B, S, D = x.shape
    d_ff = packed["w1_t"].shape[1]
    assert D % nhead == 0

    # src_mask is passed positionally to nn.MultiheadAttention -> key_padding_mask.
    # Keep it as a (B, 1, S) additive row (broadcast against scores in-kernel)
    # instead of materializing a (B, S, S) mask in HBM.
    neg_mask = jnp.where(key_padding_mask, -1e9, 0.0).astype(jnp.float32)[:, None, :]

    def full(shape):
        zeros = (0,) * len(shape)
        return pl.BlockSpec(shape, lambda b, _z=zeros: _z)

    in_specs = [
        pl.BlockSpec((1, S, D), lambda b: (b, 0, 0)),   # x (one batch row / step)
        pl.BlockSpec((1, 1, S), lambda b: (b, 0, 0)),   # additive mask row
        full((D, 3 * D)), full((1, 3 * D)),    # fused qkv weight / bias
        full((D, D)), full((1, D)),            # wo_t, bo
        full((1, D)), full((1, D)),            # ln1 alpha, bias
        full((D, d_ff)), full((1, d_ff)),      # w1_t, b1
        full((d_ff, D)), full((1, D)),         # w2_t, b2
        full((1, D)), full((1, D)),            # ln2 alpha, bias
    ]

    kernel = functools.partial(encoder_block_kernel, nhead=nhead)
    return pl.pallas_call(
        kernel,
        out_shape=jax.ShapeDtypeStruct((B, S, D), jnp.float32),
        grid=(B,),
        in_specs=in_specs,
        out_specs=pl.BlockSpec((1, S, D), lambda b: (b, 0, 0)),
        compiler_params=pltpu.CompilerParams(
            # Batch rows are independent -> megacore sharding (grid has >= 2
            # steps, so this actually engages) and DMA/compute pipelining.
            dimension_semantics=("parallel",),
            # 32 MiB: lifts v5e's 16 MiB scoped default, matches v6e default,
            # safely under v7x's 64 MiB physical VMEM.
            vmem_limit_bytes=32 * 1024 * 1024,
        ),
    )(x, neg_mask,
      packed["w_qkv"], packed["b_qkv"], packed["wo_t"], packed["bo"],
      packed["ln1_a"], packed["ln1_b"],
      packed["w1_t"], packed["b1"], packed["w2_t"], packed["b2"],
      packed["ln2_a"], packed["ln2_b"])


def encoder_block_ref(x, key_padding_mask, params, nhead):
    """Pure-JAX f32 reference mirroring the PyTorch forward (eval mode)."""
    B, S, D = x.shape
    hd = D // nhead
    add_mask = jnp.where(key_padding_mask[:, None, :], -1e9, 0.0)

    def ln(y, a, b):
        mean = jnp.mean(y, -1, keepdims=True)
        diff = y - mean
        var = jnp.sum(diff * diff, -1, keepdims=True) / (D - 1.0)
        return a * diff / (jnp.sqrt(var) + EPS) + b

    xn = ln(x, params["ln1_a"], params["ln1_b"])
    q = xn @ params["wq_t"] + params["bq"]
    k = xn @ params["wk_t"] + params["bk"]
    v = xn @ params["wv_t"] + params["bv"]
    qh = q.reshape(B, S, nhead, hd).transpose(0, 2, 1, 3)
    kh = k.reshape(B, S, nhead, hd).transpose(0, 2, 1, 3)
    vh = v.reshape(B, S, nhead, hd).transpose(0, 2, 1, 3)
    scores = jnp.einsum("bhqd,bhkd->bhqk", qh, kh) / math.sqrt(hd)
    scores = scores + add_mask[:, None, :, :]
    p = jax.nn.softmax(scores, axis=-1)
    attn = jnp.einsum("bhqk,bhkd->bhqd", p, vh).transpose(0, 2, 1, 3).reshape(B, S, D)
    attn = attn @ params["wo_t"] + params["bo"]
    x1 = x + attn

    xn2 = ln(x1, params["ln2_a"], params["ln2_b"])
    ff = jnp.maximum(xn2 @ params["w1_t"] + params["b1"], 0.0) @ params["w2_t"] + params["b2"]
    return x1 + ff


if __name__ == "__main__":
    # NOTE: real deployments should use S, D that are multiples of (8, 128) so
    # output stores are lane-dense; the demo stays small for a quick check.
    B, S, D, d_ff, nhead = 2, 8, 32, 64, 4

    key = jax.random.PRNGKey(0)
    ks = jax.random.split(key, 16)

    def init(k, shape, scale=0.1):
        return (scale * jax.random.normal(k, shape)).astype(jnp.float32)

    # Weights are stored pre-transposed (in, out) so the kernel computes x @ W_t + b,
    # matching torch's y = x @ W^T + b with W of shape (out, in).
    params = {
        "wq_t": init(ks[0], (D, D)), "bq": init(ks[1], (1, D)),
        "wk_t": init(ks[2], (D, D)), "bk": init(ks[3], (1, D)),
        "wv_t": init(ks[4], (D, D)), "bv": init(ks[5], (1, D)),
        "wo_t": init(ks[6], (D, D)), "bo": init(ks[7], (1, D)),
        "ln1_a": jnp.ones((1, D), jnp.float32), "ln1_b": jnp.zeros((1, D), jnp.float32),
        "w1_t": init(ks[8], (D, d_ff)), "b1": init(ks[9], (1, d_ff)),
        "w2_t": init(ks[10], (d_ff, D)), "b2": init(ks[11], (1, D)),
        "ln2_a": jnp.ones((1, D), jnp.float32), "ln2_b": jnp.zeros((1, D), jnp.float32),
    }

    x = init(ks[12], (B, S, D), scale=1.0)
    # src_mask -> key_padding_mask: mask out the last key position of batch 1.
    key_padding_mask = jnp.zeros((B, S), dtype=bool).at[1, S - 1].set(True)

    packed = pack_params(params, nhead)              # one-time weight packing
    out = encoder_block(x, key_padding_mask, packed, nhead)
    out = jax.block_until_ready(out)

    ref = encoder_block_ref(x, key_padding_mask, params, nhead)
    max_err = float(jnp.max(jnp.abs(out - ref)))
    # bf16 matmul operands + approx reciprocals -> looser tolerance than pure f32.
    assert jnp.allclose(out, ref, atol=3e-2, rtol=3e-2), f"max_err={max_err}"

    print("KERNEL_OK")
</pallas_src>

<mosaic_0001>
module attributes {stable_mosaic.version = 11 : i64} {
  func.func @encoder_block_kernel(%arg0: i32, %arg1: memref<1x8x32xf32, #tpu.memory_space<vmem>>, %arg2: memref<1x1x8xf32, #tpu.memory_space<vmem>>, %arg3: memref<32x96xbf16, #tpu.memory_space<vmem>>, %arg4: memref<1x96xf32, #tpu.memory_space<vmem>>, %arg5: memref<32x32xbf16, #tpu.memory_space<vmem>>, %arg6: memref<1x32xf32, #tpu.memory_space<vmem>>, %arg7: memref<1x32xf32, #tpu.memory_space<vmem>>, %arg8: memref<1x32xf32, #tpu.memory_space<vmem>>, %arg9: memref<32x64xbf16, #tpu.memory_space<vmem>>, %arg10: memref<1x64xf32, #tpu.memory_space<vmem>>, %arg11: memref<64x32xbf16, #tpu.memory_space<vmem>>, %arg12: memref<1x32xf32, #tpu.memory_space<vmem>>, %arg13: memref<1x32xf32, #tpu.memory_space<vmem>>, %arg14: memref<1x32xf32, #tpu.memory_space<vmem>>, %arg15: memref<1x8x32xf32, #tpu.memory_space<vmem>>) attributes {dimension_semantics = [#tpu.dimension_semantics<parallel>], iteration_bounds = array<i64: 2>, scalar_prefetch = 0 : i64, scratch_operands = 0 : i64, tpu.core_type = #tpu.core_type<tc>, window_params = [{transform_indices = @transform_0, window_bounds = array<i64: 1, 8, 32>}, {transform_indices = @transform_1, window_bounds = array<i64: 1, 1, 8>}, {pipeline_mode = #tpu.pipeline_mode<synchronous>, transform_indices = @transform_2, window_bounds = array<i64: 32, 96>}, {pipeline_mode = #tpu.pipeline_mode<synchronous>, transform_indices = @transform_3, window_bounds = array<i64: 1, 96>}, {pipeline_mode = #tpu.pipeline_mode<synchronous>, transform_indices = @transform_4, window_bounds = array<i64: 32, 32>}, {pipeline_mode = #tpu.pipeline_mode<synchronous>, transform_indices = @transform_5, window_bounds = array<i64: 1, 32>}, {pipeline_mode = #tpu.pipeline_mode<synchronous>, transform_indices = @transform_6, window_bounds = array<i64: 1, 32>}, {pipeline_mode = #tpu.pipeline_mode<synchronous>, transform_indices = @transform_7, window_bounds = array<i64: 1, 32>}, {pipeline_mode = #tpu.pipeline_mode<synchronous>, transform_indices = @transform_8, window_bounds = array<i64: 32, 64>}, {pipeline_mode = #tpu.pipeline_mode<synchronous>, transform_indices = @transform_9, window_bounds = array<i64: 1, 64>}, {pipeline_mode = #tpu.pipeline_mode<synchronous>, transform_indices = @transform_10, window_bounds = array<i64: 64, 32>}, {pipeline_mode = #tpu.pipeline_mode<synchronous>, transform_indices = @transform_11, window_bounds = array<i64: 1, 32>}, {pipeline_mode = #tpu.pipeline_mode<synchronous>, transform_indices = @transform_12, window_bounds = array<i64: 1, 32>}, {pipeline_mode = #tpu.pipeline_mode<synchronous>, transform_indices = @transform_13, window_bounds = array<i64: 1, 32>}, {transform_indices = @transform_14, window_bounds = array<i64: 1, 8, 32>}]} {
    %c0 = arith.constant 0 : index
    %c0_0 = arith.constant 0 : index
    %c0_1 = arith.constant 0 : index
    %0 = vector.load %arg1[%c0, %c0_0, %c0_1] : memref<1x8x32xf32, #tpu.memory_space<vmem>>, vector<1x8x32xf32>
    %1 = vector.shape_cast %0 : vector<1x8x32xf32> to vector<8x32xf32>
    %c0_2 = arith.constant 0 : index
    %c0_3 = arith.constant 0 : index
    %c0_4 = arith.constant 0 : index
    %2 = vector.load %arg2[%c0_2, %c0_3, %c0_4] : memref<1x1x8xf32, #tpu.memory_space<vmem>>, vector<1x1x8xf32>
    %3 = vector.shape_cast %2 : vector<1x1x8xf32> to vector<1x8xf32>
    %c0_5 = arith.constant 0 : index
    %c0_6 = arith.constant 0 : index
    %4 = vector.load %arg7[%c0_5, %c0_6] : memref<1x32xf32, #tpu.memory_space<vmem>>, vector<1x32xf32>
    %c0_7 = arith.constant 0 : index
    %c0_8 = arith.constant 0 : index
    %5 = vector.load %arg8[%c0_7, %c0_8] : memref<1x32xf32, #tpu.memory_space<vmem>>, vector<1x32xf32>
    %cst = arith.constant dense<0.000000e+00> : vector<8xf32>
    %6 = vector.multi_reduction <add>, %1, %cst [1] : vector<8x32xf32> to vector<8xf32>
    %7 = vector.shape_cast %6 : vector<8xf32> to vector<8x1xf32>
    %cst_9 = arith.constant 3.200000e+01 : f32
    %8 = vector.broadcast %cst_9 : f32 to vector<8x1xf32>
    %9 = arith.divf %7, %8 : vector<8x1xf32>
    %10 = vector.broadcast %9 : vector<8x1xf32> to vector<8x32xf32>
    %11 = arith.subf %1, %10 : vector<8x32xf32>
    %12 = arith.mulf %11, %11 : vector<8x32xf32>
    %cst_10 = arith.constant dense<0.000000e+00> : vector<8xf32>
    %13 = vector.multi_reduction <add>, %12, %cst_10 [1] : vector<8x32xf32> to vector<8xf32>
    %14 = vector.shape_cast %13 : vector<8xf32> to vector<8x1xf32>
    %cst_11 = arith.constant 3.100000e+01 : f32
    %15 = vector.broadcast %cst_11 : f32 to vector<8x1xf32>
    %16 = arith.divf %14, %15 : vector<8x1xf32>
    %17 = math.sqrt %16 : vector<8x1xf32>
    %cst_12 = arith.constant 9.99999997E-7 : f32
    %18 = vector.broadcast %cst_12 : f32 to vector<8x1xf32>
    %19 = arith.addf %17, %18 : vector<8x1xf32>
    %20 = tpu.reciprocal %19 {approx = true} : vector<8x1xf32> -> vector<8x1xf32>
    %21 = vector.broadcast %4 : vector<1x32xf32> to vector<8x32xf32>
    %22 = arith.mulf %21, %11 : vector<8x32xf32>
    %23 = vector.broadcast %20 : vector<8x1xf32> to vector<8x32xf32>
    %24 = arith.mulf %22, %23 : vector<8x32xf32>
    %25 = vector.broadcast %5 : vector<1x32xf32> to vector<8x32xf32>
    %26 = arith.addf %24, %25 : vector<8x32xf32>
    %27 = arith.truncf %26 : vector<8x32xf32> to vector<8x32xbf16>
    %c0_13 = arith.constant 0 : index
    %c0_14 = arith.constant 0 : index
    %28 = vector.load %arg3[%c0_13, %c0_14] : memref<32x96xbf16, #tpu.memory_space<vmem>>, vector<32x96xbf16>
    %cst_15 = arith.constant dense<0.000000e+00> : vector<8x96xf32>
    %29 = tpu.matmul %27, %28, %cst_15 {dimension_numbers = #tpu.dot_dimension_numbers<[1], [0], [0], [1], [0, 0, 1, 1], [], []>} : vector<8x32xbf16>, vector<32x96xbf16>, vector<8x96xf32> -> vector<8x96xf32>
    %c0_16 = arith.constant 0 : index
    %c0_17 = arith.constant 0 : index
    %30 = vector.load %arg4[%c0_16, %c0_17] : memref<1x96xf32, #tpu.memory_space<vmem>>, vector<1x96xf32>
    %31 = vector.broadcast %30 : vector<1x96xf32> to vector<8x96xf32>
    %32 = arith.addf %29, %31 : vector<8x96xf32>
    %33 = arith.truncf %32 : vector<8x96xf32> to vector<8x96xbf16>
    %34 = vector.extract_strided_slice %33 {offsets = [0, 0], sizes = [8, 8], strides = [1, 1]} : vector<8x96xbf16> to vector<8x8xbf16>
    %35 = vector.extract_strided_slice %33 {offsets = [0, 32], sizes = [8, 8], strides = [1, 1]} : vector<8x96xbf16> to vector<8x8xbf16>
    %36 = vector.extract_strided_slice %33 {offsets = [0, 64], sizes = [8, 8], strides = [1, 1]} : vector<8x96xbf16> to vector<8x8xbf16>
    %cst_18 = arith.constant dense<0.000000e+00> : vector<8x8xf32>
    %37 = tpu.matmul %34, %35, %cst_18 {dimension_numbers = #tpu.dot_dimension_numbers<[1], [1], [0], [0], [0, 0, 1, 0], [], []>} : vector<8x8xbf16>, vector<8x8xbf16>, vector<8x8xf32> -> vector<8x8xf32>
    %38 = vector.broadcast %3 : vector<1x8xf32> to vector<8x8xf32>
    %39 = arith.addf %37, %38 : vector<8x8xf32>
    %cst_19 = arith.constant dense<0xFF800000> : vector<8xf32>
    %40 = vector.multi_reduction <maximumf>, %39, %cst_19 [1] : vector<8x8xf32> to vector<8xf32>
    %41 = vector.shape_cast %40 : vector<8xf32> to vector<8x1xf32>
    %42 = vector.broadcast %41 : vector<8x1xf32> to vector<8x8xf32>
    %43 = arith.subf %39, %42 : vector<8x8xf32>
    %44 = math.exp %43 : vector<8x8xf32>
    %cst_20 = arith.constant dense<0.000000e+00> : vector<8xf32>
    %45 = vector.multi_reduction <add>, %44, %cst_20 [1] : vector<8x8xf32> to vector<8xf32>
    %46 = vector.shape_cast %45 : vector<8xf32> to vector<8x1xf32>
    %47 = tpu.reciprocal %46 {approx = true} : vector<8x1xf32> -> vector<8x1xf32>
    %48 = vector.broadcast %47 : vector<8x1xf32> to vector<8x8xf32>
    %49 = arith.mulf %44, %48 : vector<8x8xf32>
    %50 = arith.truncf %49 : vector<8x8xf32> to vector<8x8xbf16>
    %cst_21 = arith.constant dense<0.000000e+00> : vector<8x8xf32>
    %51 = tpu.matmul %50, %36, %cst_21 {dimension_numbers = #tpu.dot_dimension_numbers<[1], [0], [0], [1], [0, 0, 1, 1], [], []>} : vector<8x8xbf16>, vector<8x8xbf16>, vector<8x8xf32> -> vector<8x8xf32>
    %52 = arith.truncf %51 : vector<8x8xf32> to vector<8x8xbf16>
    %53 = vector.extract_strided_slice %33 {offsets = [0, 8], sizes = [8, 8], strides = [1, 1]} : vector<8x96xbf16> to vector<8x8xbf16>
    %54 = vector.extract_strided_slice %33 {offsets = [0, 40], sizes = [8, 8], strides = [1, 1]} : vector<8x96xbf16> to vector<8x8xbf16>
    %55 = vector.extract_strided_slice %33 {offsets = [0, 72], sizes = [8, 8], strides = [1, 1]} : vector<8x96xbf16> to vector<8x8xbf16>
    %cst_22 = arith.constant dense<0.000000e+00> : vector<8x8xf32>
    %56 = tpu.matmul %53, %54, %cst_22 {dimension_numbers = #tpu.dot_dimension_numbers<[1], [1], [0], [0], [0, 0, 1, 0], [], []>} : vector<8x8xbf16>, vector<8x8xbf16>, vector<8x8xf32> -> vector<8x8xf32>
    %57 = vector.broadcast %3 : vector<1x8xf32> to vector<8x8xf32>
    %58 = arith.addf %56, %57 : vector<8x8xf32>
    %cst_23 = arith.constant dense<0xFF800000> : vector<8xf32>
    %59 = vector.multi_reduction <maximumf>, %58, %cst_23 [1] : vector<8x8xf32> to vector<8xf32>
    %60 = vector.shape_cast %59 : vector<8xf32> to vector<8x1xf32>
    %61 = vector.broadcast %60 : vector<8x1xf32> to vector<8x8xf32>
    %62 = arith.subf %58, %61 : vector<8x8xf32>
    %63 = math.exp %62 : vector<8x8xf32>
    %cst_24 = arith.constant dense<0.000000e+00> : vector<8xf32>
    %64 = vector.multi_reduction <add>, %63, %cst_24 [1] : vector<8x8xf32> to vector<8xf32>
    %65 = vector.shape_cast %64 : vector<8xf32> to vector<8x1xf32>
    %66 = tpu.reciprocal %65 {approx = true} : vector<8x1xf32> -> vector<8x1xf32>
    %67 = vector.broadcast %66 : vector<8x1xf32> to vector<8x8xf32>
    %68 = arith.mulf %63, %67 : vector<8x8xf32>
    %69 = arith.truncf %68 : vector<8x8xf32> to vector<8x8xbf16>
    %cst_25 = arith.constant dense<0.000000e+00> : vector<8x8xf32>
    %70 = tpu.matmul %69, %55, %cst_25 {dimension_numbers = #tpu.dot_dimension_numbers<[1], [0], [0], [1], [0, 0, 1, 1], [], []>} : vector<8x8xbf16>, vector<8x8xbf16>, vector<8x8xf32> -> vector<8x8xf32>
    %71 = arith.truncf %70 : vector<8x8xf32> to vector<8x8xbf16>
    %72 = vector.extract_strided_slice %33 {offsets = [0, 16], sizes = [8, 8], strides = [1, 1]} : vector<8x96xbf16> to vector<8x8xbf16>
    %73 = vector.extract_strided_slice %33 {offsets = [0, 48], sizes = [8, 8], strides = [1, 1]} : vector<8x96xbf16> to vector<8x8xbf16>
    %74 = vector.extract_strided_slice %33 {offsets = [0, 80], sizes = [8, 8], strides = [1, 1]} : vector<8x96xbf16> to vector<8x8xbf16>
    %cst_26 = arith.constant dense<0.000000e+00> : vector<8x8xf32>
    %75 = tpu.matmul %72, %73, %cst_26 {dimension_numbers = #tpu.dot_dimension_numbers<[1], [1], [0], [0], [0, 0, 1, 0], [], []>} : vector<8x8xbf16>, vector<8x8xbf16>, vector<8x8xf32> -> vector<8x8xf32>
    %76 = vector.broadcast %3 : vector<1x8xf32> to vector<8x8xf32>
    %77 = arith.addf %75, %76 : vector<8x8xf32>
    %cst_27 = arith.constant dense<0xFF800000> : vector<8xf32>
    %78 = vector.multi_reduction <maximumf>, %77, %cst_27 [1] : vector<8x8xf32> to vector<8xf32>
    %79 = vector.shape_cast %78 : vector<8xf32> to vector<8x1xf32>
    %80 = vector.broadcast %79 : vector<8x1xf32> to vector<8x8xf32>
    %81 = arith.subf %77, %80 : vector<8x8xf32>
    %82 = math.exp %81 : vector<8x8xf32>
    %cst_28 = arith.constant dense<0.000000e+00> : vector<8xf32>
    %83 = vector.multi_reduction <add>, %82, %cst_28 [1] : vector<8x8xf32> to vector<8xf32>
    %84 = vector.shape_cast %83 : vector<8xf32> to vector<8x1xf32>
    %85 = tpu.reciprocal %84 {approx = true} : vector<8x1xf32> -> vector<8x1xf32>
    %86 = vector.broadcast %85 : vector<8x1xf32> to vector<8x8xf32>
    %87 = arith.mulf %82, %86 : vector<8x8xf32>
    %88 = arith.truncf %87 : vector<8x8xf32> to vector<8x8xbf16>
    %cst_29 = arith.constant dense<0.000000e+00> : vector<8x8xf32>
    %89 = tpu.matmul %88, %74, %cst_29 {dimension_numbers = #tpu.dot_dimension_numbers<[1], [0], [0], [1], [0, 0, 1, 1], [], []>} : vector<8x8xbf16>, vector<8x8xbf16>, vector<8x8xf32> -> vector<8x8xf32>
    %90 = arith.truncf %89 : vector<8x8xf32> to vector<8x8xbf16>
    %91 = vector.extract_strided_slice %33 {offsets = [0, 24], sizes = [8, 8], strides = [1, 1]} : vector<8x96xbf16> to vector<8x8xbf16>
    %92 = vector.extract_strided_slice %33 {offsets = [0, 56], sizes = [8, 8], strides = [1, 1]} : vector<8x96xbf16> to vector<8x8xbf16>
    %93 = vector.extract_strided_slice %33 {offsets = [0, 88], sizes = [8, 8], strides = [1, 1]} : vector<8x96xbf16> to vector<8x8xbf16>
    %cst_30 = arith.constant dense<0.000000e+00> : vector<8x8xf32>
    %94 = tpu.matmul %91, %92, %cst_30 {dimension_numbers = #tpu.dot_dimension_numbers<[1], [1], [0], [0], [0, 0, 1, 0], [], []>} : vector<8x8xbf16>, vector<8x8xbf16>, vector<8x8xf32> -> vector<8x8xf32>
    %95 = vector.broadcast %3 : vector<1x8xf32> to vector<8x8xf32>
    %96 = arith.addf %94, %95 : vector<8x8xf32>
    %cst_31 = arith.constant dense<0xFF800000> : vector<8xf32>
    %97 = vector.multi_reduction <maximumf>, %96, %cst_31 [1] : vector<8x8xf32> to vector<8xf32>
    %98 = vector.shape_cast %97 : vector<8xf32> to vector<8x1xf32>
    %99 = vector.broadcast %98 : vector<8x1xf32> to vector<8x8xf32>
    %100 = arith.subf %96, %99 : vector<8x8xf32>
    %101 = math.exp %100 : vector<8x8xf32>
    %cst_32 = arith.constant dense<0.000000e+00> : vector<8xf32>
    %102 = vector.multi_reduction <add>, %101, %cst_32 [1] : vector<8x8xf32> to vector<8xf32>
    %103 = vector.shape_cast %102 : vector<8xf32> to vector<8x1xf32>
    %104 = tpu.reciprocal %103 {approx = true} : vector<8x1xf32> -> vector<8x1xf32>
    %105 = vector.broadcast %104 : vector<8x1xf32> to vector<8x8xf32>
    %106 = arith.mulf %101, %105 : vector<8x8xf32>
    %107 = arith.truncf %106 : vector<8x8xf32> to vector<8x8xbf16>
    %cst_33 = arith.constant dense<0.000000e+00> : vector<8x8xf32>
    %108 = tpu.matmul %107, %93, %cst_33 {dimension_numbers = #tpu.dot_dimension_numbers<[1], [0], [0], [1], [0, 0, 1, 1], [], []>} : vector<8x8xbf16>, vector<8x8xbf16>, vector<8x8xf32> -> vector<8x8xf32>
    %109 = arith.truncf %108 : vector<8x8xf32> to vector<8x8xbf16>
    %110 = tpu.concatenate %52, %71, %90, %109 in 1 : vector<8x8xbf16>, vector<8x8xbf16>, vector<8x8xbf16>, vector<8x8xbf16> -> vector<8x32xbf16>
    %c0_34 = arith.constant 0 : index
    %c0_35 = arith.constant 0 : index
    %111 = vector.load %arg5[%c0_34, %c0_35] : memref<32x32xbf16, #tpu.memory_space<vmem>>, vector<32x32xbf16>
    %cst_36 = arith.constant dense<0.000000e+00> : vector<8x32xf32>
    %112 = tpu.matmul %110, %111, %cst_36 {dimension_numbers = #tpu.dot_dimension_numbers<[1], [0], [0], [1], [0, 0, 1, 1], [], []>} : vector<8x32xbf16>, vector<32x32xbf16>, vector<8x32xf32> -> vector<8x32xf32>
    %c0_37 = arith.constant 0 : index
    %c0_38 = arith.constant 0 : index
    %113 = vector.load %arg6[%c0_37, %c0_38] : memref<1x32xf32, #tpu.memory_space<vmem>>, vector<1x32xf32>
    %114 = vector.broadcast %113 : vector<1x32xf32> to vector<8x32xf32>
    %115 = arith.addf %112, %114 : vector<8x32xf32>
    %116 = arith.addf %1, %115 : vector<8x32xf32>
    %c0_39 = arith.constant 0 : index
    %c0_40 = arith.constant 0 : index
    %117 = vector.load %arg13[%c0_39, %c0_40] : memref<1x32xf32, #tpu.memory_space<vmem>>, vector<1x32xf32>
    %c0_41 = arith.constant 0 : index
    %c0_42 = arith.constant 0 : index
    %118 = vector.load %arg14[%c0_41, %c0_42] : memref<1x32xf32, #tpu.memory_space<vmem>>, vector<1x32xf32>
    %cst_43 = arith.constant dense<0.000000e+00> : vector<8xf32>
    %119 = vector.multi_reduction <add>, %116, %cst_43 [1] : vector<8x32xf32> to vector<8xf32>
    %120 = vector.shape_cast %119 : vector<8xf32> to vector<8x1xf32>
    %cst_44 = arith.constant 3.200000e+01 : f32
    %121 = vector.broadcast %cst_44 : f32 to vector<8x1xf32>
    %122 = arith.divf %120, %121 : vector<8x1xf32>
    %123 = vector.broadcast %122 : vector<8x1xf32> to vector<8x32xf32>
    %124 = arith.subf %116, %123 : vector<8x32xf32>
    %125 = arith.mulf %124, %124 : vector<8x32xf32>
    %cst_45 = arith.constant dense<0.000000e+00> : vector<8xf32>
    %126 = vector.multi_reduction <add>, %125, %cst_45 [1] : vector<8x32xf32> to vector<8xf32>
    %127 = vector.shape_cast %126 : vector<8xf32> to vector<8x1xf32>
    %cst_46 = arith.constant 3.100000e+01 : f32
    %128 = vector.broadcast %cst_46 : f32 to vector<8x1xf32>
    %129 = arith.divf %127, %128 : vector<8x1xf32>
    %130 = math.sqrt %129 : vector<8x1xf32>
    %cst_47 = arith.constant 9.99999997E-7 : f32
    %131 = vector.broadcast %cst_47 : f32 to vector<8x1xf32>
    %132 = arith.addf %130, %131 : vector<8x1xf32>
    %133 = tpu.reciprocal %132 {approx = true} : vector<8x1xf32> -> vector<8x1xf32>
    %134 = vector.broadcast %117 : vector<1x32xf32> to vector<8x32xf32>
    %135 = arith.mulf %134, %124 : vector<8x32xf32>
    %136 = vector.broadcast %133 : vector<8x1xf32> to vector<8x32xf32>
    %137 = arith.mulf %135, %136 : vector<8x32xf32>
    %138 = vector.broadcast %118 : vector<1x32xf32> to vector<8x32xf32>
    %139 = arith.addf %137, %138 : vector<8x32xf32>
    %140 = arith.truncf %139 : vector<8x32xf32> to vector<8x32xbf16>
    %c0_48 = arith.constant 0 : index
    %c0_49 = arith.constant 0 : index
    %141 = vector.load %arg9[%c0_48, %c0_49] : memref<32x64xbf16, #tpu.memory_space<vmem>>, vector<32x64xbf16>
    %cst_50 = arith.constant dense<0.000000e+00> : vector<8x64xf32>
    %142 = tpu.matmul %140, %141, %cst_50 {dimension_numbers = #tpu.dot_dimension_numbers<[1], [0], [0], [1], [0, 0, 1, 1], [], []>} : vector<8x32xbf16>, vector<32x64xbf16>, vector<8x64xf32> -> vector<8x64xf32>
    %c0_51 = arith.constant 0 : index
    %c0_52 = arith.constant 0 : index
    %143 = vector.load %arg10[%c0_51, %c0_52] : memref<1x64xf32, #tpu.memory_space<vmem>>, vector<1x64xf32>
    %144 = vector.broadcast %143 : vector<1x64xf32> to vector<8x64xf32>
    %145 = arith.addf %142, %144 : vector<8x64xf32>
    %cst_53 = arith.constant 0.000000e+00 : f32
    %146 = vector.broadcast %cst_53 : f32 to vector<8x64xf32>
    %147 = arith.maximumf %145, %146 : vector<8x64xf32>
    %148 = arith.truncf %147 : vector<8x64xf32> to vector<8x64xbf16>
    %c0_54 = arith.constant 0 : index
    %c0_55 = arith.constant 0 : index
    %149 = vector.load %arg11[%c0_54, %c0_55] : memref<64x32xbf16, #tpu.memory_space<vmem>>, vector<64x32xbf16>
    %cst_56 = arith.constant dense<0.000000e+00> : vector<8x32xf32>
    %150 = tpu.matmul %148, %149, %cst_56 {dimension_numbers = #tpu.dot_dimension_numbers<[1], [0], [0], [1], [0, 0, 1, 1], [], []>} : vector<8x64xbf16>, vector<64x32xbf16>, vector<8x32xf32> -> vector<8x32xf32>
    %c0_57 = arith.constant 0 : index
    %c0_58 = arith.constant 0 : index
    %151 = vector.load %arg12[%c0_57, %c0_58] : memref<1x32xf32, #tpu.memory_space<vmem>>, vector<1x32xf32>
    %152 = vector.broadcast %151 : vector<1x32xf32> to vector<8x32xf32>
    %153 = arith.addf %150, %152 : vector<8x32xf32>
    %154 = arith.addf %116, %153 : vector<8x32xf32>
    %c0_59 = arith.constant 0 : index
    %c0_60 = arith.constant 0 : index
    %c0_61 = arith.constant 0 : index
    %155 = vector.load %arg15[%c0_59, %c0_60, %c0_61] : memref<1x8x32xf32, #tpu.memory_space<vmem>>, vector<1x8x32xf32>
    %156 = vector.shape_cast %155 : vector<1x8x32xf32> to vector<8x32xf32>
    %157 = vector.shape_cast %154 : vector<8x32xf32> to vector<1x8x32xf32>
    tpu.vector_store %arg15[%c0_59, %c0_60, %c0_61], %157 {strides = array<i32>} : memref<1x8x32xf32, #tpu.memory_space<vmem>>, vector<1x8x32xf32>,
    return
  }
  func.func @transform_0(%arg0: i32) -> (i32, i32, i32) {
    %c0_i32 = arith.constant 0 : i32
    %c0_i32_0 = arith.constant 0 : i32
    %c0_i32_1 = arith.constant 0 : i32
    return %arg0, %c0_i32, %c0_i32_0 : i32, i32, i32
  }
  func.func @transform_1(%arg0: i32) -> (i32, i32, i32) {
    %c0_i32 = arith.constant 0 : i32
    %c0_i32_0 = arith.constant 0 : i32
    %c0_i32_1 = arith.constant 0 : i32
    return %arg0, %c0_i32, %c0_i32_0 : i32, i32, i32
  }
  func.func @transform_2(%arg0: i32) -> (i32, i32) {
    %c0_i32 = arith.constant 0 : i32
    %c0_i32_0 = arith.constant 0 : i32
    %c0_i32_1 = arith.constant 0 : i32
    return %c0_i32, %c0_i32_0 : i32, i32
  }
  func.func @transform_3(%arg0: i32) -> (i32, i32) {
    %c0_i32 = arith.constant 0 : i32
    %c0_i32_0 = arith.constant 0 : i32
    %c0_i32_1 = arith.constant 0 : i32
    return %c0_i32, %c0_i32_0 : i32, i32
  }
  func.func @transform_4(%arg0: i32) -> (i32, i32) {
    %c0_i32 = arith.constant 0 : i32
    %c0_i32_0 = arith.constant 0 : i32
    %c0_i32_1 = arith.constant 0 : i32
    return %c0_i32, %c0_i32_0 : i32, i32
  }
  func.func @transform_5(%arg0: i32) -> (i32, i32) {
    %c0_i32 = arith.constant 0 : i32
    %c0_i32_0 = arith.constant 0 : i32
    %c0_i32_1 = arith.constant 0 : i32
    return %c0_i32, %c0_i32_0 : i32, i32
  }
  func.func @transform_6(%arg0: i32) -> (i32, i32) {
    %c0_i32 = arith.constant 0 : i32
    %c0_i32_0 = arith.constant 0 : i32
    %c0_i32_1 = arith.constant 0 : i32
    return %c0_i32, %c0_i32_0 : i32, i32
  }
  func.func @transform_7(%arg0: i32) -> (i32, i32) {
    %c0_i32 = arith.constant 0 : i32
    %c0_i32_0 = arith.constant 0 : i32
    %c0_i32_1 = arith.constant 0 : i32
    return %c0_i32, %c0_i32_0 : i32, i32
  }
  func.func @transform_8(%arg0: i32) -> (i32, i32) {
    %c0_i32 = arith.constant 0 : i32
    %c0_i32_0 = arith.constant 0 : i32
    %c0_i32_1 = arith.constant 0 : i32
    return %c0_i32, %c0_i32_0 : i32, i32
  }
  func.func @transform_9(%arg0: i32) -> (i32, i32) {
    %c0_i32 = arith.constant 0 : i32
    %c0_i32_0 = arith.constant 0 : i32
    %c0_i32_1 = arith.constant 0 : i32
    return %c0_i32, %c0_i32_0 : i32, i32
  }
  func.func @transform_10(%arg0: i32) -> (i32, i32) {
    %c0_i32 = arith.constant 0 : i32
    %c0_i32_0 = arith.constant 0 : i32
    %c0_i32_1 = arith.constant 0 : i32
    return %c0_i32, %c0_i32_0 : i32, i32
  }
  func.func @transform_11(%arg0: i32) -> (i32, i32) {
    %c0_i32 = arith.constant 0 : i32
    %c0_i32_0 = arith.constant 0 : i32
    %c0_i32_1 = arith.constant 0 : i32
    return %c0_i32, %c0_i32_0 : i32, i32
  }
  func.func @transform_12(%arg0: i32) -> (i32, i32) {
    %c0_i32 = arith.constant 0 : i32
    %c0_i32_0 = arith.constant 0 : i32
    %c0_i32_1 = arith.constant 0 : i32
    return %c0_i32, %c0_i32_0 : i32, i32
  }
  func.func @transform_13(%arg0: i32) -> (i32, i32) {
    %c0_i32 = arith.constant 0 : i32
    %c0_i32_0 = arith.constant 0 : i32
    %c0_i32_1 = arith.constant 0 : i32
    return %c0_i32, %c0_i32_0 : i32, i32
  }
  func.func @transform_14(%arg0: i32) -> (i32, i32, i32) {
    %c0_i32 = arith.constant 0 : i32
    %c0_i32_0 = arith.constant 0 : i32
    %c0_i32_1 = arith.constant 0 : i32
    return %arg0, %c0_i32, %c0_i32_0 : i32, i32, i32
  }
}

</mosaic_0001>

<bundles_post_ra>
// kernel: tpu_custom_call.1
= control target key start
LH: loop header
LB: loop body
LE: loop exit
PB: predicated region body
PF: predicated region fallthrough
CT: control target
= control target key end

     0   :  { %19 = vsyncpa [#allocation3], 0  ;;  %s2160_s0 = inlined_call_operand.vmem [shape: f32[2,8,32], index: 0, kind: input, shape index: {}]   ;;  %s2161_s1 = inlined_call_operand.vmem [shape: f32[2,1,8], index: 1, kind: input, shape index: {}]   ;;  %s2162_s2 = inlined_call_operand.vmem [shape: bf16[32,96], index: 2, kind: input, shape index: {}]   ;;  %s2163_s3 = inlined_call_operand.vmem [shape: f32[1,96], index: 3, kind: input, shape index: {}]   ;;  %s2164_s4 = inlined_call_operand.vmem [shape: bf16[32,32], index: 4, kind: input, shape index: {}]   ;;  %s2165_s5 = inlined_call_operand.vmem [shape: f32[1,32], index: 5, kind: input, shape index: {}]   ;;  %s2166_s6 = inlined_call_operand.vmem [shape: f32[1,32], index: 6, kind: input, shape index: {}]   ;;  %s2167_s7 = inlined_call_operand.vmem [shape: f32[1,32], index: 7, kind: input, shape index: {}]   ;;  %s2168_s8 = inlined_call_operand.hbm [shape: bf16[32,64], index: 8, kind: input, shape index: {}]   ;;  %s2169_s9 = inlined_call_operand.vmem [shape: f32[1,64], index: 9, kind: input, shape index: {}]   ;;  %s2170_s10 = inlined_call_operand.vmem [shape: bf16[64,32], index: 10, kind: input, shape index: {}]   ;;  %s2171_s11 = inlined_call_operand.vmem [shape: f32[1,32], index: 11, kind: input, shape index: {}]   ;;  %s2172_s12 = inlined_call_operand.vmem [shape: f32[1,32], index: 12, kind: input, shape index: {}]   ;;  %s2173_s13 = inlined_call_operand.vmem [shape: f32[1,32], index: 13, kind: input, shape index: {}]   ;;  %s2174_s14 = inlined_call_operand.hbm [shape: f32[2,8,32], index: 14, kind: output, shape index: {}]  }
   0x1   :  { %20 = vsyncpa [#allocation4], 0 }
   0x2   :  { %22 = vsyncpa [#allocation4 + $0x1], 0  ;;  %s1871_s29 = smov 0   ;;  %s1873_s30 = smov 0  }
   0x3   :  { %s1875_s15 = smov 0   ;;  %s1877_s16 = smov 0  }
   0x4 LB: > { %2182 = sst [smem:[#allocation8_spill]] %s1770_s15  ;;  %s1892_s17 = sadd.s32 4294967295, %s1774_s16   ;;  %s1774_s16 = sphi %s1877_s16, %s2196_s16   ;;  %s1770_s15 = sphi %s1875_s15, %s2198_s15   ;;  %s1766_s30 = sphi %s1873_s30, %s2200_s30   ;;  %s1762_s29 = sphi %s1871_s29, %s2199_s29  }
   0x5   : > { %s1421_s18 = sadd.s32 4294967294, %s1774_s16   ;;  %s1896_s19 = sadd.s32 1, %s1774_s16  }
   0x6   : > { %2183 = sst [smem:[#allocation9_spill]] %s1896_s19  ;;  %s339_s20 = sadd.s32 1, %s1770_s15 }
   0x7   : > { %s336_s21 = ssub.s32 %s1774_s16, %s1896_s19  ;;  %p349_p0 = scmp.ne.s32.totalorder %s1770_s15, %s1766_s30 }
   0x8   : > { %p337_p1 = scmp.eq.s32.totalorder %s336_s21, 0  ;;  %p350_p2 = scmp.eq.s32.totalorder %s1892_s17, 1 }
   0x9   : > { %p355_p3 = scmp.ne.s32.totalorder %s1766_s30, %s1762_s29  ;;  %p356_p4 = scmp.eq.s32.totalorder %s1421_s18, 1 }
   0xa   : > { %s1907_s22 = scalar_select %p337_p1, %s1770_s15, %s339_s20  }
   0xb   : > { %p1909_p5 = por %p350_p2, %p349_p0  ;;  %p1913_p6 = por %p356_p4, %p355_p3 }
   0xc   : > { %2184 = sst [smem:[#allocation10_spill]] %s1907_s22  ;;  %p1422_p7 = scmp.ge.s32.totalorder %s1774_s16, 1 }
   0xd   : > { %s2185_s23 = scalar_select %p1909_p5, 1, 0 }
   0xe   : > { %s2186_s24 = scalar_select %p1913_p6, 1, 0 }
   0xf   : > { %p363_p8 = scmp.lt.s32.totalorder %s1774_s16, 3  ;;  %p2179_p9 = scmp.eq.s32.totalorder %s1892_s17, 0 }
  0x10   : > { %2187 = sst [smem:[#allocation11_spill]] %s2186_s24  ;;  %s1776_s26 = smov [#allocation2]  }
  0x11   : > { %p1920_p10 = pnand %p1422_p7, %p363_p8  ;;  %s393_s27 = sshll.u32 %s1776_s26, 4  ;;  %s394_s27 = int_to_ptr.vmem [resolvable:$true] %s393_s27 }
  0x12   : > { %s1680_s21 = scalar_lea.hbm %s2168_s8, 256 }
  0x13   : > { %s2188_s25 = scalar_select %p1920_p10, 1, 0 }
  0x14   : > { %p1584_p11 = pneg %p1920_p10  ;;  %p1681_p13 = scmp.ne.s32.totalorder %s2168_s8, %s1680_s21 }
  0x15   : > { %p1687_p3 = scmp.lt.u32.totalorder %s1680_s21, %s2168_s8 }
  0x16   : > { %p1928_p12 = pnand %p2179_p9, %p1584_p11 }
  0x18   : > { %p1682_p0 = pneg %p1928_p12 }
  0x1a   : > { %p1683_p1 = pnand %p1682_p0, %p1681_p13 }
  0x1c   : > { %p1684_p2 = pneg %p1683_p1 }
  0x1e   : > { %p1689_p4 = pnand %p1687_p3, %p1684_p2 }
  0x20   : > { %1692 = shalt.err (!%p1689_p4)
}
  0x21   : > { %s1693_s24 = scalar_lea.vmem %s394_s27, 256  ;;  %p1701_p9 = scmp.lt.s32.totalorder %s394_s27, %s394_s27 }
  0x22   : > { %p1694_p7 = scmp.ne.s32.totalorder %s394_s27, %s1693_s24  ;;  %p1702_p6 = scmp.lt.s32.totalorder %s1693_s24, %s1693_s24 }
  0x24   : > { %p1696_p8 = pnand %p1694_p7, %p1682_p0  ;;  %p1703_p5 = por %p1702_p6, %p1701_p9 }
  0x26   : > { %p1697_p11 = pneg %p1696_p8 }
  0x28   : > { %p1704_p10 = pnand %p1703_p5, %p1697_p11 }
  0x2a   : > { %1707 = shalt.err (!%p1704_p10)
}
  0x2b   : > { %s1777_s15 = smov 64   ;;  %s1778_s22 = smov 4  }
  0x2c   : > { %1587 = dma.hbm_to_vmem [thread:$0]  (!%p1928_p12), %s2168_s8, 256, %s394_s27, [#allocation3], %s1777_s15, %s1777_s15, %s1778_s22  }
  0x2d   : > { %p2190_p13 = scmp.ne.s32.totalorder %s2188_s25, 0 }
  0x2e   : > { %p2191_p1 = scmp.eq.s32.totalorder (!%p2190_p13), %s1892_s17, 0 }
  0x2f   : > { %437 = sbr.rel (%p2190_p13) target bundleno = 2642 (0xa52), region = 76 }
  0x36   : > { %1753 = dma.done.wait (%p2191_p1), [#allocation3], 256   ;;  %p2192_p0 = pmov %p2191_p1 }
  0x37   : > { %p485_p5 = scmp.lt.s32.totalorder %s1892_s17, 1  ;;  %vm497_vm0 = vcmask 261120   ;;  %v1646_v7 = vld [vmem:[%s2162_s2] sm:$0xff]   ;;  %v1779_v8 = vmov 0.0   ;;  %vm1780_vm1 = vmmov 0   ;;  %v1647_v9 = vld [vmem:[%s2162_s2 + $0x8] sm:$0xff]  }
  0x38   : > { %1755 = vsyncadd (%p2192_p0), [#allocation3], 4294967040  ;;  %1494 = vmatprep.subr.bf16.mxu0 %v1779_v8  ;;  %1498 = vmatprep.mubr.msk.bf16.mxu0 %vm1780_vm1, %v1779_v8  ;;  %v1429_v18 = vld [vmem:[%s2166_s6] ss:$0 sm:$0xff]  ;;  %s1781_s25 = smov 120   ;;  %s1782_s26 = smov 96  }
  0x39   : > { %s1956_s19 = scalar_select %p485_p5, %s1892_s17, 1  ;;  %1495 = vmatpush3.bf16.msra.mxu0 %v1646_v7  ;;  %1502 = vmatprep.subr.bf16.mxu1 %v1779_v8  ;;  %v1430_v21 = vld [vmem:[%s2167_s7] ss:$0 sm:$0xff]  ;;  %vm611_vm4 = vcmask 64512   ;;  %vm675_vm5 = vcmask 1043456   ;;  %vm1065_vm6 = vcmask 130048  }
  0x3a   : > { %1496 = vmatprep.subr.bf16.mxu0 %v1779_v8  ;;  %1504 = vmatprep.mubr.msk.bf16.mxu1 %vm1780_vm1, %v1779_v8  ;;  %v1431_v25 = vld [vmem:[%s2163_s3] ss:$0 sm:$0xff]  ;;  %s1783_s15 = smov 88   ;;  %s1784_s22 = smov 80   ;;  %vm1068_vm7 = vcmask 195584   ;;  %vm1281_vm10 = vcmask 523264  }
  0x3b   : > { %s1428_s24 = sshll.u32 %s1956_s19, 3  ;;  %s1785_s18 = smov 112  }
  0x3c   : > { %s488_s27 = scalar_lea.vmem %s2160_s0, %s1428_s24  ;;  %s1786_s20 = smov 72  }
  0x3d   : > { %v1962_v0 = vld [vmem:[%s488_s27] sm:$0xff]  ;;  %1497 = vmatpush3.bf16.msra.mxu0 %v1647_v9  ;;  %s1787_s24 = smov 104   ;;  %s491_s27 = scalar_lea.vmem %s2161_s1, %s1956_s19 }
  0x3e   : > { %v498_v1 = vsel %vm497_vm0, %v1962_v0, 0.0  ;;  %1508 = vmatprep.subr.bf16.mxu0 %v1779_v8  ;;  %v1435_v43 = vld [vmem:[%s491_s27] ss:$0 sm:$0xff]  ;;  %s1788_s19 = smov 64   ;;  %s1793_s21 = smov 16  }
  0x3f   : > { %499 = vadd.xlane.f32.xlu0 %v498_v1  ;;  %s1794_s27 = smov 24   ;;  %p2193_p9 = scmp.ne.s32.totalorder %s2185_s23, 0 }
  0xcc   : > { %v500_v2 = vpop.xlane.xlu0 %499 }
  0xcd   : > { %v502_v3 = vmul.f32 0.03125, %v500_v2 }
  0xcf   : > { %v503_v4 = vsub.f32 %v1962_v0, %v502_v3 }
  0xd1   : > { %v504_v5 = vmul.f32 %v503_v4, %v503_v4  ;;  %v525_v19 = vmul.f32 %v1429_v18, %v503_v4 }
  0xd3   : > { %v505_v6 = vsel %vm497_vm0, %v504_v5, 0.0 }
  0xd4   : > { %506 = vadd.xlane.f32.xlu0 %v505_v6 }
 0x161   : > { %v507_v10 = vpop.xlane.xlu0 %506 }
 0x162   : > { %v509_v11 = vmul.f32 0.032258064, %v507_v10 }
 0x164   : > { %1656 = vrsqrt.f32 %v509_v11  ;;  %vm512_vm2 = vcmp.eq.f32.partialorder %v509_v11, inf  ;;  %v515_v14 = vand.u32 2147483648, %v509_v11  ;;  %vm514_vm3 = vcmp.eq.f32.partialorder %v509_v11, 0.0 }
 0x16e   : > { %v1657_v12 = vpop.eup %1656 }
 0x16f   : > { %v511_v13 = vmul.f32 %v1657_v12, %v509_v11 }
 0x171   : > { %v513_v15 = vsel %vm512_vm2, %v509_v11, %v511_v13 }
 0x172   : > { %v516_v16 = vsel %vm514_vm3, %v515_v14, %v513_v15 }
 0x173   : > { %v517_v17 = vadd.f32 1e-06, %v516_v16 }
 0x175   : > { %1658 = vrcp.f32 %v517_v17 }
 0x17f   : > { %v1659_v20 = vpop.eup %1658 }
 0x180   : > { %v526_v22 = vmul.f32 %v1659_v20, %v525_v19 }
 0x182   : > { %v533_v23 = vadd.f32 %v1430_v21, %v526_v22 }
 0x184   : > { %v534_v24 = vpack.c.bf16 %v533_v23, %v533_v23 }
 0x186   : > { %1499 = vmatmul.mubr.msk.bf16.vlgmr.msra.gmra.mrb[0].mxu0 %vm497_vm0, %v534_v24 }
 0x187   : > { %1510 = vmatprep.mubr.msk.bf16.mxu0 %vm1780_vm1, %v1779_v8 }
 0x259   : > { %v595_v26 = vpop.f32.mrb[0].mxu0 }
 0x25a   : > { %v596_v27 = vadd.f32 %v1431_v25, %v595_v26  ;;  %v1500_v28 = vpop.f32.mrb[1].mxu0 }
 0x25b   : > { %v598_v29 = vpop.f32.mrb[2].mxu0 }
 0x25c   : > { %v1994_v30 = vpack.c.bf16 %v596_v27, %v596_v27  ;;  %v1501_v31 = vpop.f32.mrb[3].mxu0 }
 0x25e   : > { %720 = vrot.lane.b32.xlu0 %v1994_v30, %s1781_s25  ;;  %609 = vrot.lane.b32.xlu1 %v1994_v30, %s1782_s26  ;;  %s1789_s25 = smov 56   ;;  %s1790_s26 = smov 48  }
 0x262   : > { %722 = vrot.lane.b32.xlu1 %v1994_v30, %s1783_s15  ;;  %s1791_s15 = smov 40  }
 0x266   : > { %833 = vrot.lane.b32.xlu1 %v1994_v30, %s1784_s22  ;;  %s1792_s22 = smov 8  }
 0x26a   : > { %831 = vrot.lane.b32.xlu1 %v1994_v30, %s1785_s18  ;;  %s482_s18 = sand.u32 1, %s1766_s30  }
 0x26e   : > { %944 = vrot.lane.b32.xlu1 %v1994_v30, %s1786_s20  ;;  %s1427_s20 = sshll.u32 %s482_s18, 3 }
 0x272   : > { %942 = vrot.lane.b32.xlu1 %v1994_v30, %s1787_s24 }
 0x2d0   : > { %v610_v32 = vpop.permute.xlu1 %609  ;;  %v721_v37 = vpop.permute.xlu0 %720 }
 0x2d1   : > { %v616_v33 = vsel %vm611_vm4, %v610_v32, 0 }
 0x2d2   : > { %1503 = vmatpush3.bf16.xpose.msra.mxu1 %v616_v33 }
 0x2d3   : > { %1514 = vmatprep.subr.bf16.mxu1 %v1779_v8 }
 0x2d4   : > { %v723_v34 = vpop.permute.xlu1 %722 }
 0x2d5   : > { %v728_v35 = vsel %vm611_vm4, %v723_v34, 0 }
 0x2d8   : > { %v834_v36 = vpop.permute.xlu1 %833 }
 0x2d9   : > { %1505 = vmatmul.mubr.msk.bf16.vlgmr.msra.gmra.mrb[0].mxu1 %vm611_vm4, %v1994_v30  ;;  %v839_v39 = vsel %vm611_vm4, %v834_v36, 0 }
 0x2da   : > { %1515 = vmatpush3.bf16.xpose.msra.mxu1 %v728_v35  ;;  %1516 = vmatprep.mubr.msk.bf16.mxu1 %vm1780_vm1, %v1779_v8 }
 0x2db   : > { %1526 = vmatprep.subr.bf16.mxu1 %v1779_v8 }
 0x2dc   : > { %v832_v38 = vpop.permute.xlu1 %831 }
 0x2e0   : > { %v945_v40 = vpop.permute.xlu1 %944 }
 0x2e1   : > { %1517 = vmatmul.mubr.msk.bf16.vlgmr.msra.gmra.mrb[4].mxu1 %vm611_vm4, %v721_v37  ;;  %v950_v41 = vsel %vm611_vm4, %v945_v40, 0 }
 0x2e2   : > { %1527 = vmatpush3.bf16.xpose.msra.mxu1 %v839_v39  ;;  %1528 = vmatprep.mubr.msk.bf16.mxu1 %vm1780_vm1, %v1779_v8 }
 0x2e3   : > { %1538 = vmatprep.subr.bf16.mxu1 %v1779_v8 }
 0x2e4   : > { %v943_v42 = vpop.permute.xlu1 %942 }
 0x2e9   : > { %1529 = vmatmul.mubr.msk.bf16.vlgmr.msra.gmra.mrb[8].mxu1 %vm611_vm4, %v832_v38 }
 0x2ea   : > { %1539 = vmatpush3.bf16.xpose.msra.mxu1 %v950_v41  ;;  %1540 = vmatprep.mubr.msk.bf16.mxu1 %vm1780_vm1, %v1779_v8 }
 0x2eb   : > { %1550 = vmatprep.subr.bf16.mxu1 %v1779_v8 }
 0x2f1   : > { %1541 = vmatmul.mubr.msk.bf16.vlgmr.msra.gmra.mrb[12].mxu1 %vm611_vm4, %v943_v42 }
 0x2f2   : > { %1554 = vmatprep.mubr.msk.bf16.mxu1 %vm1780_vm1, %v1779_v8 }
 0x3ac   : > { %v652_v44 = vpop.f32.mrb[0].mxu1 }
 0x3ad   : > { %v653_v45 = vadd.f32 %v1435_v43, %v652_v44  ;;  %v1506_v46 = vpop.f32.mrb[1].mxu1 }
 0x3ae   : > { %v655_v47 = vpop.f32.mrb[2].mxu1 }
 0x3af   : > { %v1507_v48 = vpop.f32.mrb[3].mxu1  ;;  %v658_v49 = vsel %vm611_vm4, %v653_v45, -inf }
 0x3b0   : > { %659 = vmax.xlane.f32.xlu1 %v658_v49 }
 0x3b4   : > { %v764_v50 = vpop.f32.mrb[4].mxu1 }
 0x3b5   : > { %v765_v51 = vadd.f32 %v1435_v43, %v764_v50  ;;  %v1518_v52 = vpop.f32.mrb[5].mxu1 }
 0x3b6   : > { %v767_v53 = vpop.f32.mrb[6].mxu1 }
 0x3b7   : > { %v1519_v54 = vpop.f32.mrb[7].mxu1  ;;  %v770_v55 = vsel %vm611_vm4, %v765_v51, -inf }
 0x3b8   : > { %771 = vmax.xlane.f32.xlu0 %v770_v55 }
 0x3bc   : > { %v875_v56 = vpop.f32.mrb[8].mxu1 }
 0x3bd   : > { %v876_v57 = vadd.f32 %v1435_v43, %v875_v56  ;;  %v1530_v58 = vpop.f32.mrb[9].mxu1 }
 0x3be   : > { %v878_v59 = vpop.f32.mrb[10].mxu1 }
 0x3bf   : > { %v1531_v60 = vpop.f32.mrb[11].mxu1  ;;  %v881_v61 = vsel %vm611_vm4, %v876_v57, -inf  ;;  %v1648_v59 = vld [vmem:[%s2164_s4] sm:$0xff]  }
 0x3c0   : > { %882 = vmax.xlane.f32.xlu1 %v881_v61  ;;  %1551 = vmatpush3.bf16.msra.mxu1 %v1648_v59  ;;  %v1649_v60 = vld [vmem:[%s2164_s4 + $0x8] sm:$0xff]  }
 0x3c1   : > { %1552 = vmatprep.subr.bf16.mxu1 %v1779_v8 }
 0x3c4   : > { %v986_v62 = vpop.f32.mrb[12].mxu1  ;;  %1553 = vmatpush3.bf16.msra.mxu1 %v1649_v60 }
 0x3c5   : > { %v987_v63 = vadd.f32 %v1435_v43, %v986_v62  ;;  %v1542_v1 = vpop.f32.mrb[13].mxu1  ;;  %1566 = vmatprep.subr.bf16.mxu1 %v1779_v8 }
 0x3c6   : > { %v989_v2 = vpop.f32.mrb[14].mxu1 }
 0x3c7   : > { %v1543_v3 = vpop.f32.mrb[15].mxu1  ;;  %v992_v4 = vsel %vm611_vm4, %v987_v63, -inf }
 0x3c8   : > { %993 = vmax.xlane.f32.xlu0 %v992_v4 }
 0x43d   : > { %v660_v5 = vpop.xlane.xlu1 %659 }
 0x43e   : > { %v661_v6 = vsub.f32 %v653_v45, %v660_v5 }
 0x440   : > { %v662_v7 = vmul.f32 1.442695, %v661_v6 }
 0x442   : > { %1660 = vpow2.f32 %v662_v7 }
 0x445   : > { %v772_v9 = vpop.xlane.xlu0 %771 }
 0x446   : > { %v773_v10 = vsub.f32 %v765_v51, %v772_v9 }
 0x448   : > { %v774_v11 = vmul.f32 1.442695, %v773_v10 }
 0x44a   : > { %1662 = vpow2.f32 %v774_v11 }
 0x44c   : > { %v1661_v12 = vpop.eup %1660 }
 0x44d   : > { %v664_v13 = vsel %vm611_vm4, %v1661_v12, 0.0  ;;  %v883_v21 = vpop.xlane.xlu1 %882 }
 0x44e   : > { %665 = vadd.xlane.f32.xlu1 %v664_v13  ;;  %v884_v22 = vsub.f32 %v876_v57, %v883_v21 }
 0x450   : > { %v885_v23 = vmul.f32 1.442695, %v884_v22 }
 0x454   : > { %v1663_v14 = vpop.eup %1662 }
 0x455   : > { %v994_v15 = vpop.xlane.xlu0 %993  ;;  %v776_v16 = vsel %vm611_vm4, %v1663_v14, 0.0 }
 0x456   : > { %v995_v17 = vsub.f32 %v987_v63, %v994_v15  ;;  %777 = vadd.xlane.f32.xlu0 %v776_v16  ;;  %v1444_v16 = vld [vmem:[%s2165_s5] ss:$0 sm:$0xff] }
 0x458   : > { %v996_v18 = vmul.f32 1.442695, %v995_v17 }
 0x45a   : > { %1664 = vpow2.f32 %v996_v18 }
 0x45b   : > { %1666 = vpow2.f32 %v885_v23 }
 0x45f   : > { %670 = vrot.lane.b32.xlu1 %v1994_v30, %s1788_s19 }
 0x464   : > { %v1665_v19 = vpop.eup %1664 }
 0x465   : > { %v998_v20 = vsel %vm611_vm4, %v1665_v19, 0.0  ;;  %v1667_v24 = vpop.eup %1666 }
 0x466   : > { %999 = vadd.xlane.f32.xlu0 %v998_v20  ;;  %v887_v25 = vsel %vm611_vm4, %v1667_v24, 0.0 }
 0x47c   : > { %782 = vrot.lane.b32.xlu0 %v1994_v30, %s1789_s25 }
 0x483   : > { %888 = vadd.xlane.f32.xlu1 %v887_v25 }
 0x494   : > { %893 = vrot.lane.b32.xlu1 %v1994_v30, %s1790_s26 }
 0x498   : > { %1004 = vrot.lane.b32.xlu1 %v1994_v30, %s1791_s15 }
 0x4db   : > { %v666_v26 = vpop.xlane.xlu1 %665 }
 0x4dc   : > { %1668 = vrcp.f32 %v666_v26 }
 0x4df   : > { %v671_v27 = vpop.permute.xlu1 %670 }
 0x4e0   : > { %v677_v28 = vsel %vm675_vm5, %v671_v27, 0 }
 0x4e1   : > { %1509 = vmatpush3.bf16.msra.mxu0 %v677_v28 }
 0x4e2   : > { %1520 = vmatprep.subr.bf16.mxu0 %v1779_v8 }
 0x4e3   : > { %v778_v31 = vpop.xlane.xlu0 %777 }
 0x4e4   : > { %1670 = vrcp.f32 %v778_v31  ;;  %v1651_v31 = vld [vmem:[#allocation2 + $0x8] sm:$0xff]  }
 0x4e6   : > { %v1669_v29 = vpop.eup %1668 }
 0x4e7   : > { %v668_v32 = vmul.f32 %v1669_v29, %v1661_v12  ;;  %v1650_v29 = vld [vmem:[#allocation2] sm:$0xff]  }
 0x4e9   : > { %v669_v33 = vpack.c.bf16 %v668_v32, %v668_v32  ;;  %v1653_v32 = vld [vmem:[%s2170_s10 + $0x8] sm:$0xff]  }
 0x4eb   : > { %1511 = vmatmul.mubr.msk.bf16.vlgmr.msra.gmra.mrb[4].mxu0 %vm611_vm4, %v669_v33 }
 0x4ec   : > { %1522 = vmatprep.mubr.msk.bf16.mxu0 %vm1780_vm1, %v1779_v8 }
 0x4ee   : > { %v1671_v30 = vpop.eup %1670 }
 0x4ef   : > { %v780_v35 = vmul.f32 %v1671_v30, %v1663_v14 }
 0x4f1   : > { %v781_v38 = vpack.c.bf16 %v780_v35, %v780_v35 }
 0x4f3   : > { %v1000_v34 = vpop.xlane.xlu0 %999 }
 0x4f7   : > { %v783_v36 = vpop.permute.xlu0 %782 }
 0x4f8   : > { %v788_v37 = vsel %vm675_vm5, %v783_v36, 0 }
 0x4f9   : > { %1521 = vmatpush3.bf16.msra.mxu0 %v788_v37 }
 0x4fa   : > { %1532 = vmatprep.subr.bf16.mxu0 %v1779_v8 }
 0x4fc   : > { %1523 = vmatmul.mubr.msk.bf16.vlgmr.msra.gmra.mrb[8].mxu0 %vm611_vm4, %v781_v38 }
 0x4fd   : > { %1534 = vmatprep.mubr.msk.bf16.mxu0 %vm1780_vm1, %v1779_v8 }
 0x510   : > { %v889_v39 = vpop.xlane.xlu1 %888 }
 0x511   : > { %1672 = vrcp.f32 %v889_v39 }
 0x512   : > { %1674 = vrcp.f32 %v1000_v34 }
 0x514   : > { %v894_v40 = vpop.permute.xlu1 %893 }
 0x515   : > { %v899_v41 = vsel %vm675_vm5, %v894_v40, 0  ;;  %v1448_v40 = vld [vmem:[%s2172_s12] ss:$0 sm:$0xff] }
 0x516   : > { %1533 = vmatpush3.bf16.msra.mxu0 %v899_v41 }
 0x517   : > { %1544 = vmatprep.subr.bf16.mxu0 %v1779_v8 }
 0x518   : > { %v1005_v44 = vpop.permute.xlu1 %1004 }
 0x519   : > { %v1010_v47 = vsel %vm675_vm5, %v1005_v44, 0 }
 0x51b   : > { %v1673_v42 = vpop.eup %1672 }
 0x51c   : > { %v891_v43 = vmul.f32 %v1673_v42, %v1667_v24  ;;  %v1675_v46 = vpop.eup %1674 }
 0x51d   : > { %v1002_v48 = vmul.f32 %v1675_v46, %v1665_v19 }
 0x51e   : > { %v892_v45 = vpack.c.bf16 %v891_v43, %v891_v43  ;;  %v1449_v43 = vld [vmem:[%s2173_s13] ss:$0 sm:$0xff] }
 0x51f   : > { %v1003_v49 = vpack.c.bf16 %v1002_v48, %v1002_v48  ;;  %v1655_v48 = vld [vmem:[%s2170_s10 + $0x18] sm:$0xff]  }
 0x520   : > { %1535 = vmatmul.mubr.msk.bf16.vlgmr.msra.gmra.mrb[12].mxu0 %vm611_vm4, %v892_v45 }
 0x521   : > { %1545 = vmatpush3.bf16.msra.mxu0 %v1010_v47  ;;  %1546 = vmatprep.mubr.msk.bf16.mxu0 %vm1780_vm1, %v1779_v8  ;;  %v1654_v47 = vld [vmem:[%s2170_s10 + $0x10] sm:$0xff]  }
 0x522   : > { %1558 = vmatprep.subr.bf16.mxu0 %v1779_v8 }
 0x528   : > { %1547 = vmatmul.mubr.msk.bf16.vlgmr.msra.gmra.mrb[16].mxu0 %vm611_vm4, %v1003_v49  ;;  %v1450_v49 = vld [vmem:[%s2169_s9] ss:$0 sm:$0xff] }
 0x529   : > { %1562 = vmatprep.mubr.msk.bf16.mxu0 %vm1780_vm1, %v1779_v8  ;;  %1559 = vmatpush3.bf16.msra.mxu0 %v1650_v29 }
 0x52a   : > { %1560 = vmatprep.subr.bf16.mxu0 %v1779_v8 }
 0x52d   : > { %1561 = vmatpush3.bf16.msra.mxu0 %v1651_v31 }
 0x5be   : > { %v713_v50 = vpop.f32.mrb[4].mxu0 }
 0x5bf   : > { %v1512_v51 = vpop.f32.mrb[5].mxu0  ;;  %v719_v10 = vpack.c.bf16 %v713_v50, %v713_v50 }
 0x5c0   : > { %v716_v52 = vpop.f32.mrb[6].mxu0 }
 0x5c1   : > { %v1513_v53 = vpop.f32.mrb[7].mxu0 }
 0x5cf   : > { %v824_v54 = vpop.f32.mrb[8].mxu0 }
 0x5d0   : > { %v830_v55 = vpack.c.bf16 %v824_v54, %v824_v54  ;;  %v1524_v56 = vpop.f32.mrb[9].mxu0 }
 0x5d1   : > { %v827_v57 = vpop.f32.mrb[10].mxu0 }
 0x5d2   : > { %1054 = vrot.lane.b32.xlu0 %v830_v55, %s1792_s22  ;;  %v1525_v58 = vpop.f32.mrb[11].mxu0 }
 0x5f3   : > { %v935_v61 = vpop.f32.mrb[12].mxu0 }
 0x5f4   : > { %v941_v62 = vpack.c.bf16 %v935_v61, %v935_v61  ;;  %v1536_v63 = vpop.f32.mrb[13].mxu0 }
 0x5f5   : > { %v938_v1 = vpop.f32.mrb[14].mxu0 }
 0x5f6   : > { %1057 = vrot.lane.b32.xlu1 %v941_v62, %s1793_s21  ;;  %v1537_v2 = vpop.f32.mrb[15].mxu0  ;;  %s1461_s21 = sshll.u32 %s1892_s17, 7  ;;  %s1328_s17 = scalar_lea.sflag [#allocation4], %s482_s18 }
 0x5f7   : > { %s2117_s15 = scalar_lea.hbm %s2174_s14, %s1461_s21 }
 0x5fb   : > { %v1046_v3 = vpop.f32.mrb[16].mxu0 }
 0x5fc   : > { %v1052_v4 = vpack.c.bf16 %v1046_v3, %v1046_v3  ;;  %v1548_v5 = vpop.f32.mrb[17].mxu0 }
 0x5fd   : > { %v1049_v6 = vpop.f32.mrb[18].mxu0 }
 0x5fe   : > { %1060 = vrot.lane.b32.xlu0 %v1052_v4, %s1794_s27  ;;  %v1549_v7 = vpop.f32.mrb[19].mxu0  ;;  %s484_s27 = scalar_lea.vmem [#allocation5], %s1427_s20  ;;  %s1795_s20 = smov [#allocation5]  }
 0x5ff   : > { %s1341_s19 = sshll.u32 %s484_s27, 4  ;;  %s1712_s24 = sshll.u32 %s1795_s20, 4  ;;  %s2119_s19 = int_to_ptr.vmem [resolvable:$true] %s1341_s19  ;;  %s1713_s24 = int_to_ptr.vmem [resolvable:$false] %s1712_s24 }
 0x600   : > { %s1708_s22 = scalar_lea.vmem %s2119_s19, 128  ;;  %s1714_s28 = scalar_lea.vmem %s1713_s24, 256 }
 0x601   : > { %p1709_p6 = scmp.ne.s32.totalorder %s2119_s19, %s1708_s22  ;;  %p1715_p2 = scmp.lt.s32.totalorder %s2119_s19, %s1713_s24 }
 0x602   : > { %p1716_p3 = scmp.lt.s32.totalorder %s1714_s28, %s1708_s22 }
 0x603   : > { %p1710_p10 = pnand %p1709_p6, %p2193_p9 }
 0x604   : > { %p1717_p4 = por %p1716_p3, %p1715_p2 }
 0x605   : > { %p1711_p12 = pneg %p1710_p10 }
 0x607   : > { %p1718_p7 = pnand %p1717_p4, %p1711_p12 }
 0x644   : > { %v1055_v9 = vpop.permute.xlu0 %1054 }
 0x645   : > { %v1064_v12 = vsel %vm611_vm4, %v719_v10, %v1055_v9 }
 0x668   : > { %v1058_v11 = vpop.permute.xlu1 %1057 }
 0x669   : > { %v1067_v13 = vsel %vm1065_vm6, %v1064_v12, %v1058_v11 }
 0x670   : > { %v1061_v14 = vpop.permute.xlu0 %1060 }
 0x671   : > { %v1070_v15 = vsel %vm1068_vm7, %v1067_v13, %v1061_v14 }
 0x672   : > { %1555 = vmatmul.mubr.msk.bf16.vlgmr.msra.gmra.mrb[16].mxu1 %vm497_vm0, %v1070_v15 }
 0x673   : > { %1574 = vmatprep.mubr.msk.bf16.mxu1 %vm1780_vm1, %v1779_v8 }
 0x745   : > { %v1130_v17 = vpop.f32.mrb[16].mxu1 }
 0x746   : > { %v1131_v18 = vadd.f32 %v1444_v16, %v1130_v17  ;;  %v1556_v19 = vpop.f32.mrb[17].mxu1 }
 0x747   : > { %v1133_v20 = vpop.f32.mrb[18].mxu1 }
 0x748   : > { %v2076_v21 = vadd.f32 %v1131_v18, %v1962_v0  ;;  %v1557_v22 = vpop.f32.mrb[19].mxu1  ;;  %v1652_v0 = vld [vmem:[%s2170_s10] sm:$0xff]  }
 0x749   : > { %1567 = vmatpush3.bf16.msra.mxu1 %v1652_v0 }
 0x74a   : > { %v1139_v23 = vsel %vm497_vm0, %v2076_v21, 0.0  ;;  %1568 = vmatprep.subr.bf16.mxu1 %v1779_v8 }
 0x74b   : > { %1140 = vadd.xlane.f32.xlu1 %v1139_v23 }
 0x74d   : > { %1569 = vmatpush3.bf16.msra.mxu1 %v1653_v32 }
 0x74e   : > { %1570 = vmatprep.subr.bf16.mxu1 %v1779_v8 }
 0x751   : > { %1571 = vmatpush3.bf16.msra.mxu1 %v1654_v47 }
 0x752   : > { %1572 = vmatprep.subr.bf16.mxu1 %v1779_v8  ;;  %v1454_v8 = vld [vmem:[%s2171_s11] ss:$0 sm:$0xff] }
 0x755   : > { %1573 = vmatpush3.bf16.msra.mxu1 %v1655_v48 }
 0x7d8   : > { %v1141_v24 = vpop.xlane.xlu1 %1140 }
 0x7d9   : > { %v1142_v25 = vmul.f32 0.03125, %v1141_v24 }
 0x7db   : > { %v1143_v26 = vsub.f32 %v2076_v21, %v1142_v25 }
 0x7dd   : > { %v1144_v27 = vmul.f32 %v1143_v26, %v1143_v26  ;;  %v1164_v41 = vmul.f32 %v1448_v40, %v1143_v26 }
 0x7df   : > { %v1145_v28 = vsel %vm497_vm0, %v1144_v27, 0.0 }
 0x7e0   : > { %1146 = vadd.xlane.f32.xlu0 %v1145_v28 }
 0x86d   : > { %v1147_v33 = vpop.xlane.xlu0 %1146 }
 0x86e   : > { %v1148_v30 = vmul.f32 0.032258064, %v1147_v33 }
 0x870   : > { %1676 = vrsqrt.f32 %v1148_v30  ;;  %vm1151_vm8 = vcmp.eq.f32.partialorder %v1148_v30, inf  ;;  %v1154_v36 = vand.u32 2147483648, %v1148_v30  ;;  %vm1153_vm9 = vcmp.eq.f32.partialorder %v1148_v30, 0.0 }
 0x87a   : > { %v1677_v34 = vpop.eup %1676 }
 0x87b   : > { %v1150_v35 = vmul.f32 %v1677_v34, %v1148_v30 }
 0x87d   : > { %v1152_v37 = vsel %vm1151_vm8, %v1148_v30, %v1150_v35 }
 0x87e   : > { %v1155_v38 = vsel %vm1153_vm9, %v1154_v36, %v1152_v37 }
 0x87f   : > { %v1156_v39 = vadd.f32 1e-06, %v1155_v38 }
 0x881   : > { %1678 = vrcp.f32 %v1156_v39 }
 0x88b   : > { %v1679_v42 = vpop.eup %1678 }
 0x88c   : > { %v1165_v44 = vmul.f32 %v1679_v42, %v1164_v41 }
 0x88e   : > { %v1172_v45 = vadd.f32 %v1449_v43, %v1165_v44 }
 0x890   : > { %v1173_v46 = vpack.c.bf16 %v1172_v45, %v1172_v45 }
 0x892   : > { %1563 = vmatmul.mubr.msk.bf16.vlgmr.msra.gmra.mrb[20].mxu0 %vm497_vm0, %v1173_v46 }
 0x965   : > { %v1234_v50 = vpop.f32.mrb[20].mxu0 }
 0x966   : > { %v1235_v51 = vadd.f32 %v1450_v49, %v1234_v50  ;;  %v1564_v52 = vpop.f32.mrb[21].mxu0 }
 0x967   : > { %v1237_v53 = vpop.f32.mrb[22].mxu0 }
 0x968   : > { %v1240_v54 = vmax.f32 %v1235_v51, 0.0  ;;  %v1565_v55 = vpop.f32.mrb[23].mxu0 }
 0x96a   : > { %v1241_v56 = vpack.c.bf16 %v1240_v54, %v1240_v54 }
 0x96c   : > { %1575 = vmatmul.mubr.msk.bf16.vlgmr.msra.gmra.mrb[20].mxu1 %vm1281_vm10, %v1241_v56 }
 0xa3f   : > { %v1319_v57 = vpop.f32.mrb[20].mxu1 }
 0xa40   : > { %v1320_v58 = vadd.f32 %v1454_v8, %v1319_v57  ;;  %v1576_v59 = vpop.f32.mrb[21].mxu1 }
 0xa41   : > { %v1322_v60 = vpop.f32.mrb[22].mxu1 }
 0xa42   : > { %v1325_v61 = vadd.f32 %v1320_v58, %v2076_v21  ;;  %v1577_v62 = vpop.f32.mrb[23].mxu1 }
 0xa44   : > { %1326 = vst.msk [vmem:[%s484_s27] sm:$0xff] %vm497_vm0, %v1325_v61 }
 0xa45   : > { %1721 = shalt.err (!%p1718_p7)
}
 0xa46   : > { %s1722_s18 = scalar_lea.hbm %s2117_s15, 128  ;;  %s1726_s25 = scalar_lea.hbm %s2174_s14, 256 }
 0xa47   : > { %p1723_p8 = scmp.ne.s32.totalorder %s2117_s15, %s1722_s18  ;;  %p1727_p1 = scmp.lt.u32.totalorder %s2117_s15, %s2174_s14 }
 0xa48   : > { %p1728_p0 = scmp.lt.u32.totalorder %s1726_s25, %s1722_s18  ;;  %p1730_p6 = scmp.lt.u32.totalorder %s1722_s18, %s2117_s15 }
 0xa49   : > { %p1724_p11 = pnand %p1723_p8, %p2193_p9 }
 0xa4a   : > { %p1729_p5 = por %p1728_p0, %p1727_p1 }
 0xa4b   : > { %p1725_p13 = pneg %p1724_p11 }
 0xa4c   : > { %p1731_p10 = por %p1730_p6, %p1729_p5 }
 0xa4e   : > { %p1732_p12 = pnand %p1731_p10, %p1725_p13 }
 0xa50   : > { %1735 = shalt.err (!%p1732_p12)
}
 0xa51   : > { %1582 = dma.vmem_to_hbm [thread:$0]  (%p2193_p9), %s2119_s19, 128, %s2117_s15, %s1328_s17  }
 0xa52 PF: > { %s2194_s22 = sld [smem:[#allocation11_spill]]  ;;  %p1594_p2 = scmp.ge.s32.totalorder %s1774_s16, 2 }
 0xa53   : > { %s1353_s24 = sand.u32 1, %s1762_s29  }
 0xa54   : > { %s1354_s28 = scalar_lea.sflag [#allocation4], %s1353_s24 }
 0xa58   : > { %p2195_p3 = scmp.ne.s32.totalorder %s2194_s22, 0 }
 0xa5a   : > { %p1589_p4 = pnand %p1594_p2, %p2195_p3 }
 0xa5c   : > { %1757 = dma.done.wait (!%p1589_p4), %s1354_s28, 128  }
 0xa5d   : > { %1759 = vsyncadd (!%p1589_p4), %s1354_s28, 4294967168  ;;  %s2196_s16 = sld [smem:[#allocation9_spill]]  ;;  %s2197_s18 = sld [smem:[#allocation8_spill]] }
 0xa5e   : > { %s2198_s15 = sld [smem:[#allocation10_spill]]  ;;  %s2199_s29 = smov %s1766_s30 }
 0xa63   : > { %p25_p7 = scmp.ge.s32.totalorder %s2196_s16, 4   ;;  %s2200_s30 = smov %s2197_s18 }
 0xa65   :  { %27 = sbr.rel (!%p25_p7) target bundleno = 4 (0x4), region = 119 }
 0xa6c   :  { %1359 = vsyncpa [#allocation3], 1 }
 0xa6d   :  { %1361 = vsyncpa [#allocation3 + $0x1], 1 }
 0xa6e   :  { %1362 = vsyncpa [#allocation4], 1 }
 0xa6f   :  { %1364 = vsyncpa [#allocation4 + $0x1], 1 }

</bundles_post_ra>
